<compile_context>
chip_gen: v6e
topology: v6e:2x2x1
jax: 0.10.0
libtpu: 0.0.40
codegen_flags: <defaults>
</compile_context>

<pallas_src>
import jax
import jax.numpy as jnp
from jax.experimental import pallas as pl
from jax.experimental.pallas import tpu as pltpu

_LANE = 128
_MIN_KERNEL_BYTES = 4 << 20   # below this, a plain `return z` beats any kernel


def _cdiv(a, b):
    return -(-a // b)


def _round_up(x, m):
    return _cdiv(x, m) * m


def _device_caps():
    """Per-generation block sizing (bytes per block buffer, VMEM limit, grid)."""
    kind = ""
    try:
        kind = jax.devices()[0].device_kind.lower().replace(" ", "")
    except Exception:  # pragma: no cover - defensive; fall back to v6e defaults
        pass
    if "v5lite" in kind or "v5e" in kind:
        # 16 MiB default scoped VMEM: 2 MiB blocks (4 double-buffered = 8 MiB).
        return {"block_bytes": 2 << 20, "vmem_limit_bytes": None,
                "min_grid_steps": 1, "input_buffers": 2}
    if "v7" in kind:
        # 64 MiB physical VMEM, 2 TensorCores: 8 MiB blocks, deeper input
        # buffering, >= 4 grid steps so both cores stream.
        return {"block_bytes": 8 << 20, "vmem_limit_bytes": 48 << 20,
                "min_grid_steps": 4, "input_buffers": 3}
    # v6e (and other 128 MiB-VMEM parts): 4 MiB blocks fit the 32 MiB default.
    return {"block_bytes": 4 << 20, "vmem_limit_bytes": None,
            "min_grid_steps": 1, "input_buffers": 2}


def _identity_copy_kernel(x_ref, o_ref):
    # Lane-dense (tm, 128) tile: pure vld/vst streaming, no VPU/XLU/MXU work.
    o_ref[...] = x_ref[...]


def sphere_decoder_identity_forward(z, *, min_kernel_bytes=_MIN_KERNEL_BYTES,
                                    force_kernel=False):
    """Identity forward pass matching `SphereDecoderIdentity.forward`."""
    z = jnp.asarray(z)
    orig_shape = z.shape
    total = int(z.size)
    itemsize = int(jnp.dtype(z.dtype).itemsize)

    # Short-circuit: an identity needs no HBM traffic at all.  Empty inputs
    # must also bypass the kernel (a 0-step grid is not launchable).
    if total == 0 or (not force_kernel and total * itemsize < min_kernel_bytes):
        return z

    # dtype-aware sublane multiple: (8,128) f32, (16,128) bf16, (32,128) int8.
    sub_mult = max(8, 32 // itemsize)

    caps = _device_caps()

    rows_needed = _cdiv(total, _LANE)
    padded_total = rows_needed * _LANE

    flat = z.reshape(-1)
    if padded_total != total:
        # Pad only the single ragged tail row (< 128 elements), NOT whole
        # blocks; the ragged last grid block is masked by Pallas.
        flat = jnp.pad(flat, (0, padded_total - total))
    slab = flat.reshape(rows_needed, _LANE)   # lane-dense layout

    # Block rows: biggest block within the per-generation budget, rounded to
    # the dtype sublane multiple, with enough grid steps for all cores.
    cap_rows = max(sub_mult,
                   (caps["block_bytes"] // (_LANE * itemsize))
                   // sub_mult * sub_mult)
    tm = min(cap_rows,
             _round_up(_cdiv(rows_needed, caps["min_grid_steps"]), sub_mult))
    if tm >= rows_needed:
        tm = rows_needed          # one full-extent block (any row count legal)
    grid = _cdiv(rows_needed, tm)

    in_spec_kwargs = {}
    if caps["input_buffers"] > 2:
        in_spec_kwargs["pipeline_mode"] = pl.Buffered(caps["input_buffers"])
    in_spec = pl.BlockSpec((tm, _LANE), lambda i: (i, 0), **in_spec_kwargs)
    out_spec = pl.BlockSpec((tm, _LANE), lambda i: (i, 0))

    compiler_kwargs = {"dimension_semantics": ("parallel",)}
    if caps["vmem_limit_bytes"] is not None:
        compiler_kwargs["vmem_limit_bytes"] = caps["vmem_limit_bytes"]

    out = pl.pallas_call(
        _identity_copy_kernel,
        out_shape=jax.ShapeDtypeStruct((rows_needed, _LANE), slab.dtype),
        grid=(grid,),
        in_specs=[in_spec],
        out_specs=out_spec,
        input_output_aliases={0: 0},   # donate the slab: no second allocation
        compiler_params=pltpu.CompilerParams(**compiler_kwargs),
    )(slab)

    if padded_total == total:
        return out.reshape(orig_shape)            # pure bitcast, no extra pass
    return out.reshape(-1)[:total].reshape(orig_shape)


if __name__ == "__main__":
    key = jax.random.PRNGKey(0)
    k1, k2, k3 = jax.random.split(key, 3)

    # Small point-cloud-like inputs (batch, points, coords).
    z_aligned = jax.random.uniform(k1, (2, 64, 3), jnp.float32,
                                   minval=-0.5, maxval=0.5)   # 384 = 3*128
    z_ragged = jax.random.uniform(k2, (2, 13, 5), jnp.float32,
                                  minval=-0.5, maxval=0.5)    # 130, not /128
    z_bf16 = jax.random.uniform(k3, (4, 32, 16), jnp.float32).astype(jnp.bfloat16)

    # Fast path (no kernel launch) -- the true optimum for an identity op.
    out_fast = jax.block_until_ready(sphere_decoder_identity_forward(z_aligned))
    assert out_fast.shape == z_aligned.shape and out_fast.dtype == z_aligned.dtype
    assert bool(jnp.array_equal(out_fast, z_aligned)), "fast-path mismatch"

    # Kernel path, exercised explicitly on aligned / ragged / narrow-dtype inputs.
    for z_in in (z_aligned, z_ragged, z_bf16):
        out = jax.block_until_ready(
            sphere_decoder_identity_forward(z_in, force_kernel=True))
        assert out.shape == z_in.shape and out.dtype == z_in.dtype
        assert bool(jnp.array_equal(out, z_in)), "identity kernel mismatch"

    print("KERNEL_OK")
</pallas_src>

<mosaic_0001>
module attributes {stable_mosaic.version = 11 : i64} {
  func.func @_identity_copy_kernel(%arg0: i32, %arg1: memref<3x128xf32, #tpu.memory_space<vmem>>, %arg2: memref<3x128xf32, #tpu.memory_space<vmem>>) attributes {dimension_semantics = [#tpu.dimension_semantics<parallel>], iteration_bounds = array<i64: 1>, scalar_prefetch = 0 : i64, scratch_operands = 0 : i64, tpu.core_type = #tpu.core_type<tc>, window_params = [{transform_indices = @transform_0, window_bounds = array<i64: 3, 128>}, {transform_indices = @transform_1, window_bounds = array<i64: 3, 128>}]} {
    %c0 = arith.constant 0 : index
    %c0_0 = arith.constant 0 : index
    %0 = vector.load %arg1[%c0, %c0_0] : memref<3x128xf32, #tpu.memory_space<vmem>>, vector<3x128xf32>
    %c0_1 = arith.constant 0 : index
    %c0_2 = arith.constant 0 : index
    %1 = vector.load %arg2[%c0_1, %c0_2] : memref<3x128xf32, #tpu.memory_space<vmem>>, vector<3x128xf32>
    tpu.vector_store %arg2[%c0_1, %c0_2], %0 {strides = array<i32>} : memref<3x128xf32, #tpu.memory_space<vmem>>, vector<3x128xf32>,
    return
  }
  func.func @transform_0(%arg0: i32) -> (i32, i32) {
    %c0_i32 = arith.constant 0 : i32
    %c0_i32_0 = arith.constant 0 : i32
    return %arg0, %c0_i32 : i32, i32
  }
  func.func @transform_1(%arg0: i32) -> (i32, i32) {
    %c0_i32 = arith.constant 0 : i32
    %c0_i32_0 = arith.constant 0 : i32
    return %arg0, %c0_i32 : i32, i32
  }
}

</mosaic_0001>

<bundles_post_ra>
// kernel: tpu_custom_call.1
= control target key start
LH: loop header
LB: loop body
LE: loop exit
PB: predicated region body
PF: predicated region fallthrough
CT: control target
= control target key end

     0   :  { %6 = vsyncpa [#allocation3], 0  ;;  %s102_s0 = inlined_call_operand.hbm [shape: f32[3,128], index: 0, kind: input, shape index: {}, may-alias: {0,1}]   ;;  %s103_s1 = inlined_call_operand.hbm [shape: f32[3,128], index: 1, kind: output, shape index: {}, may-alias: {0,1}]  }
   0x1   :  { %7 = vsyncpa [#allocation4], 0  ;;  %s84_s6 = smov [#allocation2]  }
   0x2   :  { %s14_s7 = sshll.u32 %s84_s6, 4  ;;  %s15_s7 = int_to_ptr.vmem [resolvable:$true] %s14_s7 }
   0x3   :  { %s48_s8 = scalar_lea.vmem %s15_s7, 64  ;;  %p53_p1 = scmp.lt.s32.totalorder %s15_s7, %s15_s7 }
   0x4   :  { %p49_p0 = scmp.ne.s32.totalorder %s15_s7, %s48_s8  ;;  %p54_p2 = scmp.lt.s32.totalorder %s48_s8, %s48_s8 }
   0x6   :  { %p55_p3 = por %p54_p2, %p53_p1 }
   0x8   :  { %p56_p4 = pnand %p55_p3, %p49_p0 }
   0xa   :  { %59 = shalt.err (!%p56_p4)
}
   0xb   :  { %17 = dma.hbm_to_vmem [thread:$0]  %s102_s0, 64, %s15_s7, [#allocation3]  }
   0xc   :  { %80 = dma.done.wait [#allocation3], 64  }
   0xd   :  { %81 = vsyncadd [#allocation3], 4294967232  ;;  %s85_s11 = smov [#allocation5]   ;;  %v21_v0 = vld [vmem:[#allocation2] sm:$0x7] }
   0xe   :  { %s29_s12 = sshll.u32 %s85_s11, 4  ;;  %22 = vst [vmem:[#allocation5] sm:$0x7] %v21_v0  ;;  %s30_s12 = int_to_ptr.vmem [resolvable:$true] %s29_s12 }
   0xf   :  { %s60_s13 = scalar_lea.vmem %s30_s12, 64  ;;  %p65_p6 = scmp.lt.s32.totalorder %s30_s12, %s30_s12 }
  0x10   :  { %p61_p5 = scmp.ne.s32.totalorder %s30_s12, %s60_s13  ;;  %p66_p7 = scmp.lt.s32.totalorder %s60_s13, %s60_s13 }
  0x12   :  { %p67_p8 = por %p66_p7, %p65_p6 }
  0x14   :  { %p68_p9 = pnand %p67_p8, %p61_p5 }
  0x16   :  { %71 = shalt.err (!%p68_p9)
}
  0x17   :  { %32 = dma.vmem_to_hbm [thread:$0]  %s30_s12, 64, %s103_s1, [#allocation4]  }
  0x18   :  { %82 = dma.done.wait [#allocation4], 64  }
  0x19   :  { %83 = vsyncadd [#allocation4], 4294967232 }
  0x1a   :  { %36 = vsyncpa [#allocation3], 1 }
  0x1b   :  { %37 = vsyncpa [#allocation4], 1 }

</bundles_post_ra>
